<compile_context>
chip_gen: v6e
topology: v6e:2x2x1
jax: 0.10.0
libtpu: 0.0.40
codegen_flags: <defaults>
</compile_context>

<pallas_src>
import functools

import jax
import jax.numpy as jnp
from jax.experimental import pallas as pl
from jax.experimental.pallas import tpu as pltpu

OBS_SIZE = 21
OBS_WIDTH = 2
INPUT_SIZE = OBS_SIZE * OBS_WIDTH * 2   # 84
HIDDEN = 256
OUTPUT = 5

INPUT_PAD = 128    # 84 -> 128 : lane-dense first matmul / input load
OUTPUT_PAD = 128   # 5  -> 128 : lane-dense output store


def _round_up(x, m):
    return (x + m - 1) // m * m


def _pick_batch_tile(B):
    """Pick a batch tile (multiple of 16 sublanes).

    Small batches: one tile (latency path).  Medium/large batches: ~2048-row
    tiles, always keeping the grid >= 2 so both v7x TensorCores are used and
    the pipeline has something to overlap."""
    if B < 512:
        return _round_up(max(B, 1), 16)
    return min(2048, _round_up(pl.cdiv(B, 2), 256))


def _mlp_kernel(x_ref,
                w1_ref, b1_ref,
                wh_ref, bh_ref,
                w6_ref, b6_ref,
                o_ref):
    # x: bf16 (tb, 128); weights bf16; biases f32; output bf16 (tb, 128).
    h = x_ref[...]

    def linear_relu(h_bf16, w, b):
        y = jnp.dot(h_bf16, w, preferred_element_type=jnp.float32)
        y = y + b                                   # f32 bias, broadcast over rows
        # ReLU commutes with the downcast; doing it after the cast keeps the
        # max on packed bf16 vregs (half the VALU work on v6e/v7x).
        return jnp.maximum(y.astype(jnp.bfloat16), 0)

    # Layer 1: 128(padded 84) -> 256
    h = linear_relu(h, w1_ref[...], b1_ref[...])

    # Layers 2..5: 256 -> 256 (packed weights, static unrolled loop)
    for l in range(4):
        h = linear_relu(h, wh_ref[l], bh_ref[l])

    # Layer 6: 256 -> 128(padded 5), then tanh + 1.
    y = jnp.dot(h, w6_ref[...], preferred_element_type=jnp.float32) + b6_ref[...]
    # Padded output columns compute tanh(0) + 1 = 1 and are sliced away by the
    # wrapper; never read them.
    o_ref[...] = (jnp.tanh(y) + 1.0).astype(jnp.bfloat16)


def prepare_params(params):
    """One-time parameter prep (hoisted out of the per-call hot path).

    `params` = 6 tuples (w, b), w shape (in, out), b shape (out,) or (1, out),
    f32 (nn.Linear weights already transposed to (in, out))."""
    ws = [jnp.asarray(w, jnp.float32) for (w, _) in params]
    bs = [jnp.reshape(jnp.asarray(b, jnp.float32), (1, -1)) for (_, b) in params]

    w1 = jnp.pad(ws[0], ((0, INPUT_PAD - INPUT_SIZE), (0, 0))).astype(jnp.bfloat16)
    b1 = bs[0]                                                   # (1, 256) f32
    wh = jnp.stack(ws[1:5]).astype(jnp.bfloat16)                 # (4, 256, 256) bf16
    bh = jnp.stack(bs[1:5])                                      # (4, 1, 256) f32
    w6 = jnp.pad(ws[5], ((0, 0), (0, OUTPUT_PAD - OUTPUT))).astype(jnp.bfloat16)
    b6 = jnp.pad(bs[5], ((0, 0), (0, OUTPUT_PAD - OUTPUT)))      # (1, 128) f32
    return (w1, b1, wh, bh, w6, b6)


@functools.partial(jax.jit, static_argnames=("batch_tile",))
def fully_connected_continuous_2(seq, prepped, batch_tile=None):
    """Forward pass.  `seq` may have any leading shape; it is flattened to
    (-1, INPUT_SIZE), exactly like seq.view(-1, input_size) in PyTorch.
    `prepped` comes from prepare_params()."""
    w1, b1, wh, bh, w6, b6 = prepped

    x = jnp.reshape(seq, (-1, INPUT_SIZE)).astype(jnp.float32)
    B = x.shape[0]

    tb = _pick_batch_tile(B) if batch_tile is None else int(batch_tile)
    assert tb % 16 == 0, "batch_tile must be a multiple of 16 (bf16 sublane tile)"
    Bp = _round_up(B, tb)

    # Pad batch to a tile multiple and features 84 -> 128; cast to bf16.
    # (Under jit this fuses into a single pad+convert op feeding the kernel.)
    x = jnp.pad(x, ((0, Bp - B), (0, INPUT_PAD - INPUT_SIZE))).astype(jnp.bfloat16)

    def whole(shape):
        return pl.BlockSpec(shape, lambda i, _n=len(shape): (0,) * _n)

    in_specs = [
        pl.BlockSpec((tb, INPUT_PAD), lambda i: (i, 0)),   # x, batch-tiled
        whole(w1.shape), whole(b1.shape),
        whole(wh.shape), whole(bh.shape),
        whole(w6.shape), whole(b6.shape),
    ]

    # Advisory cost estimate (padded problem sizes).
    flops = 2 * Bp * (INPUT_PAD * HIDDEN + 4 * HIDDEN * HIDDEN + HIDDEN * OUTPUT_PAD)
    weight_bytes = (w1.size + wh.size + w6.size) * 2 + (b1.size + bh.size + b6.size) * 4
    cost = pl.CostEstimate(
        flops=flops,
        transcendentals=Bp * OUTPUT_PAD,
        bytes_accessed=Bp * INPUT_PAD * 2 + Bp * OUTPUT_PAD * 2 + weight_bytes,
    )

    out = pl.pallas_call(
        _mlp_kernel,
        out_shape=jax.ShapeDtypeStruct((Bp, OUTPUT_PAD), jnp.bfloat16),
        grid_spec=pltpu.PrefetchScalarGridSpec(
            num_scalar_prefetch=0,
            grid=(Bp // tb,),
            in_specs=in_specs,
            out_specs=pl.BlockSpec((tb, OUTPUT_PAD), lambda i: (i, 0)),
        ),
        compiler_params=pltpu.CompilerParams(
            dimension_semantics=("parallel",),
            vmem_limit_bytes=32 * 1024 * 1024,
        ),
        cost_estimate=cost,
    )(x, w1, b1, wh, bh, w6, b6)

    return out[:B, :OUTPUT].astype(jnp.float32)


def init_params(key):
    """Deterministic init mimicking nn.Linear (uniform +/- 1/sqrt(fan_in)).
    Weights returned as (in, out); biases as (1, out), all f32."""
    dims = [INPUT_SIZE, HIDDEN, HIDDEN, HIDDEN, HIDDEN, HIDDEN, OUTPUT]
    params = []
    for i in range(6):
        key, kw, kb = jax.random.split(key, 3)
        fan_in, fan_out = dims[i], dims[i + 1]
        bound = 1.0 / jnp.sqrt(jnp.float32(fan_in))
        w = jax.random.uniform(kw, (fan_in, fan_out), jnp.float32,
                               minval=-bound, maxval=bound)
        b = jax.random.uniform(kb, (1, fan_out), jnp.float32,
                               minval=-bound, maxval=bound)
        params.append((w, b))
    return params


def _reference(seq, params):
    x = jnp.reshape(seq, (-1, INPUT_SIZE)).astype(jnp.float32)
    h = x
    for i, (w, b) in enumerate(params):
        h = h @ w + jnp.reshape(b, (1, -1))
        if i < 5:
            h = jnp.maximum(h, 0.0)
    return jnp.tanh(h) + 1.0


if __name__ == "__main__":
    key = jax.random.PRNGKey(0)
    kp, kx1, kx2 = jax.random.split(key, 3)
    params = init_params(kp)
    prepped = prepare_params(params)   # one-time weight pad/cast

    # Small batch: batch=8 observations, each of size obs_size*obs_width*2=84.
    seq_small = jax.random.normal(kx1, (8, INPUT_SIZE), dtype=jnp.float32)
    out_small = jax.block_until_ready(fully_connected_continuous_2(seq_small, prepped))
    ref_small = _reference(seq_small, params)
    assert out_small.shape == (8, OUTPUT)
    assert jnp.allclose(out_small, ref_small, atol=3e-2, rtol=2e-2)

    # Ragged larger batch: exercises batch padding + a 2-step parallel grid.
    seq_big = jax.random.normal(kx2, (528, INPUT_SIZE), dtype=jnp.float32)
    out_big = jax.block_until_ready(fully_connected_continuous_2(seq_big, prepped))
    ref_big = _reference(seq_big, params)
    assert out_big.shape == (528, OUTPUT)
    assert jnp.allclose(out_big, ref_big, atol=3e-2, rtol=2e-2)

    print("KERNEL_OK")
</pallas_src>

<mosaic_0001>
module attributes {stable_mosaic.version = 11 : i64} {
  func.func @_mlp_kernel(%arg0: i32, %arg1: memref<16x128xbf16, #tpu.memory_space<vmem>>, %arg2: memref<128x256xbf16, #tpu.memory_space<vmem>>, %arg3: memref<1x256xf32, #tpu.memory_space<vmem>>, %arg4: memref<4x256x256xbf16, #tpu.memory_space<vmem>>, %arg5: memref<4x1x256xf32, #tpu.memory_space<vmem>>, %arg6: memref<256x128xbf16, #tpu.memory_space<vmem>>, %arg7: memref<1x128xf32, #tpu.memory_space<vmem>>, %arg8: memref<16x128xbf16, #tpu.memory_space<vmem>>) attributes {dimension_semantics = [#tpu.dimension_semantics<parallel>], iteration_bounds = array<i64: 1>, scalar_prefetch = 0 : i64, scratch_operands = 0 : i64, tpu.core_type = #tpu.core_type<tc>, window_params = [{transform_indices = @transform_0, window_bounds = array<i64: 16, 128>}, {pipeline_mode = #tpu.pipeline_mode<synchronous>, transform_indices = @transform_1, window_bounds = array<i64: 128, 256>}, {pipeline_mode = #tpu.pipeline_mode<synchronous>, transform_indices = @transform_2, window_bounds = array<i64: 1, 256>}, {pipeline_mode = #tpu.pipeline_mode<synchronous>, transform_indices = @transform_3, window_bounds = array<i64: 4, 256, 256>}, {pipeline_mode = #tpu.pipeline_mode<synchronous>, transform_indices = @transform_4, window_bounds = array<i64: 4, 1, 256>}, {pipeline_mode = #tpu.pipeline_mode<synchronous>, transform_indices = @transform_5, window_bounds = array<i64: 256, 128>}, {pipeline_mode = #tpu.pipeline_mode<synchronous>, transform_indices = @transform_6, window_bounds = array<i64: 1, 128>}, {transform_indices = @transform_7, window_bounds = array<i64: 16, 128>}]} {
    %c0 = arith.constant 0 : index
    %c0_0 = arith.constant 0 : index
    %0 = vector.load %arg1[%c0, %c0_0] : memref<16x128xbf16, #tpu.memory_space<vmem>>, vector<16x128xbf16>
    %c0_1 = arith.constant 0 : index
    %c0_2 = arith.constant 0 : index
    %1 = vector.load %arg2[%c0_1, %c0_2] : memref<128x256xbf16, #tpu.memory_space<vmem>>, vector<128x256xbf16>
    %c0_3 = arith.constant 0 : index
    %c0_4 = arith.constant 0 : index
    %2 = vector.load %arg3[%c0_3, %c0_4] : memref<1x256xf32, #tpu.memory_space<vmem>>, vector<1x256xf32>
    %cst = arith.constant dense<0.000000e+00> : vector<16x256xf32>
    %3 = tpu.matmul %0, %1, %cst {dimension_numbers = #tpu.dot_dimension_numbers<[1], [0], [0], [1], [0, 0, 1, 1], [], []>} : vector<16x128xbf16>, vector<128x256xbf16>, vector<16x256xf32> -> vector<16x256xf32>
    %4 = vector.broadcast %2 : vector<1x256xf32> to vector<16x256xf32>
    %5 = arith.addf %3, %4 : vector<16x256xf32>
    %6 = arith.truncf %5 : vector<16x256xf32> to vector<16x256xbf16>
    %cst_5 = arith.constant 0.000000e+00 : bf16
    %7 = vector.broadcast %cst_5 : bf16 to vector<16x256xbf16>
    %8 = arith.maximumf %6, %7 : vector<16x256xbf16>
    %c0_6 = arith.constant 0 : index
    %c0_7 = arith.constant 0 : index
    %c0_8 = arith.constant 0 : index
    %9 = vector.load %arg4[%c0_6, %c0_7, %c0_8] : memref<4x256x256xbf16, #tpu.memory_space<vmem>>, vector<1x256x256xbf16>
    %10 = vector.shape_cast %9 : vector<1x256x256xbf16> to vector<256x256xbf16>
    %c0_9 = arith.constant 0 : index
    %c0_10 = arith.constant 0 : index
    %c0_11 = arith.constant 0 : index
    %11 = vector.load %arg5[%c0_9, %c0_10, %c0_11] : memref<4x1x256xf32, #tpu.memory_space<vmem>>, vector<1x1x256xf32>
    %12 = vector.shape_cast %11 : vector<1x1x256xf32> to vector<1x256xf32>
    %cst_12 = arith.constant dense<0.000000e+00> : vector<16x256xf32>
    %13 = tpu.matmul %8, %10, %cst_12 {dimension_numbers = #tpu.dot_dimension_numbers<[1], [0], [0], [1], [0, 0, 1, 1], [], []>} : vector<16x256xbf16>, vector<256x256xbf16>, vector<16x256xf32> -> vector<16x256xf32>
    %14 = vector.broadcast %12 : vector<1x256xf32> to vector<16x256xf32>
    %15 = arith.addf %13, %14 : vector<16x256xf32>
    %16 = arith.truncf %15 : vector<16x256xf32> to vector<16x256xbf16>
    %cst_13 = arith.constant 0.000000e+00 : bf16
    %17 = vector.broadcast %cst_13 : bf16 to vector<16x256xbf16>
    %18 = arith.maximumf %16, %17 : vector<16x256xbf16>
    %c1 = arith.constant 1 : index
    %c0_14 = arith.constant 0 : index
    %c0_15 = arith.constant 0 : index
    %19 = vector.load %arg4[%c1, %c0_14, %c0_15] : memref<4x256x256xbf16, #tpu.memory_space<vmem>>, vector<1x256x256xbf16>
    %20 = vector.shape_cast %19 : vector<1x256x256xbf16> to vector<256x256xbf16>
    %c1_16 = arith.constant 1 : index
    %c0_17 = arith.constant 0 : index
    %c0_18 = arith.constant 0 : index
    %21 = vector.load %arg5[%c1_16, %c0_17, %c0_18] : memref<4x1x256xf32, #tpu.memory_space<vmem>>, vector<1x1x256xf32>
    %22 = vector.shape_cast %21 : vector<1x1x256xf32> to vector<1x256xf32>
    %cst_19 = arith.constant dense<0.000000e+00> : vector<16x256xf32>
    %23 = tpu.matmul %18, %20, %cst_19 {dimension_numbers = #tpu.dot_dimension_numbers<[1], [0], [0], [1], [0, 0, 1, 1], [], []>} : vector<16x256xbf16>, vector<256x256xbf16>, vector<16x256xf32> -> vector<16x256xf32>
    %24 = vector.broadcast %22 : vector<1x256xf32> to vector<16x256xf32>
    %25 = arith.addf %23, %24 : vector<16x256xf32>
    %26 = arith.truncf %25 : vector<16x256xf32> to vector<16x256xbf16>
    %cst_20 = arith.constant 0.000000e+00 : bf16
    %27 = vector.broadcast %cst_20 : bf16 to vector<16x256xbf16>
    %28 = arith.maximumf %26, %27 : vector<16x256xbf16>
    %c2 = arith.constant 2 : index
    %c0_21 = arith.constant 0 : index
    %c0_22 = arith.constant 0 : index
    %29 = vector.load %arg4[%c2, %c0_21, %c0_22] : memref<4x256x256xbf16, #tpu.memory_space<vmem>>, vector<1x256x256xbf16>
    %30 = vector.shape_cast %29 : vector<1x256x256xbf16> to vector<256x256xbf16>
    %c2_23 = arith.constant 2 : index
    %c0_24 = arith.constant 0 : index
    %c0_25 = arith.constant 0 : index
    %31 = vector.load %arg5[%c2_23, %c0_24, %c0_25] : memref<4x1x256xf32, #tpu.memory_space<vmem>>, vector<1x1x256xf32>
    %32 = vector.shape_cast %31 : vector<1x1x256xf32> to vector<1x256xf32>
    %cst_26 = arith.constant dense<0.000000e+00> : vector<16x256xf32>
    %33 = tpu.matmul %28, %30, %cst_26 {dimension_numbers = #tpu.dot_dimension_numbers<[1], [0], [0], [1], [0, 0, 1, 1], [], []>} : vector<16x256xbf16>, vector<256x256xbf16>, vector<16x256xf32> -> vector<16x256xf32>
    %34 = vector.broadcast %32 : vector<1x256xf32> to vector<16x256xf32>
    %35 = arith.addf %33, %34 : vector<16x256xf32>
    %36 = arith.truncf %35 : vector<16x256xf32> to vector<16x256xbf16>
    %cst_27 = arith.constant 0.000000e+00 : bf16
    %37 = vector.broadcast %cst_27 : bf16 to vector<16x256xbf16>
    %38 = arith.maximumf %36, %37 : vector<16x256xbf16>
    %c3 = arith.constant 3 : index
    %c0_28 = arith.constant 0 : index
    %c0_29 = arith.constant 0 : index
    %39 = vector.load %arg4[%c3, %c0_28, %c0_29] : memref<4x256x256xbf16, #tpu.memory_space<vmem>>, vector<1x256x256xbf16>
    %40 = vector.shape_cast %39 : vector<1x256x256xbf16> to vector<256x256xbf16>
    %c3_30 = arith.constant 3 : index
    %c0_31 = arith.constant 0 : index
    %c0_32 = arith.constant 0 : index
    %41 = vector.load %arg5[%c3_30, %c0_31, %c0_32] : memref<4x1x256xf32, #tpu.memory_space<vmem>>, vector<1x1x256xf32>
    %42 = vector.shape_cast %41 : vector<1x1x256xf32> to vector<1x256xf32>
    %cst_33 = arith.constant dense<0.000000e+00> : vector<16x256xf32>
    %43 = tpu.matmul %38, %40, %cst_33 {dimension_numbers = #tpu.dot_dimension_numbers<[1], [0], [0], [1], [0, 0, 1, 1], [], []>} : vector<16x256xbf16>, vector<256x256xbf16>, vector<16x256xf32> -> vector<16x256xf32>
    %44 = vector.broadcast %42 : vector<1x256xf32> to vector<16x256xf32>
    %45 = arith.addf %43, %44 : vector<16x256xf32>
    %46 = arith.truncf %45 : vector<16x256xf32> to vector<16x256xbf16>
    %cst_34 = arith.constant 0.000000e+00 : bf16
    %47 = vector.broadcast %cst_34 : bf16 to vector<16x256xbf16>
    %48 = arith.maximumf %46, %47 : vector<16x256xbf16>
    %c0_35 = arith.constant 0 : index
    %c0_36 = arith.constant 0 : index
    %49 = vector.load %arg6[%c0_35, %c0_36] : memref<256x128xbf16, #tpu.memory_space<vmem>>, vector<256x128xbf16>
    %cst_37 = arith.constant dense<0.000000e+00> : vector<16x128xf32>
    %50 = tpu.matmul %48, %49, %cst_37 {dimension_numbers = #tpu.dot_dimension_numbers<[1], [0], [0], [1], [0, 0, 1, 1], [], []>} : vector<16x256xbf16>, vector<256x128xbf16>, vector<16x128xf32> -> vector<16x128xf32>
    %c0_38 = arith.constant 0 : index
    %c0_39 = arith.constant 0 : index
    %51 = vector.load %arg7[%c0_38, %c0_39] : memref<1x128xf32, #tpu.memory_space<vmem>>, vector<1x128xf32>
    %52 = vector.broadcast %51 : vector<1x128xf32> to vector<16x128xf32>
    %53 = arith.addf %50, %52 : vector<16x128xf32>
    %54 = math.tanh %53 : vector<16x128xf32>
    %cst_40 = arith.constant 1.000000e+00 : f32
    %55 = vector.broadcast %cst_40 : f32 to vector<16x128xf32>
    %56 = arith.addf %54, %55 : vector<16x128xf32>
    %57 = arith.truncf %56 : vector<16x128xf32> to vector<16x128xbf16>
    %c0_41 = arith.constant 0 : index
    %c0_42 = arith.constant 0 : index
    %58 = vector.load %arg8[%c0_41, %c0_42] : memref<16x128xbf16, #tpu.memory_space<vmem>>, vector<16x128xbf16>
    tpu.vector_store %arg8[%c0_41, %c0_42], %57 {strides = array<i32>} : memref<16x128xbf16, #tpu.memory_space<vmem>>, vector<16x128xbf16>,
    return
  }
  func.func @transform_0(%arg0: i32) -> (i32, i32) {
    %c0_i32 = arith.constant 0 : i32
    %c0_i32_0 = arith.constant 0 : i32
    return %arg0, %c0_i32 : i32, i32
  }
  func.func @transform_1(%arg0: i32) -> (i32, i32) {
    %c0_i32 = arith.constant 0 : i32
    %c0_i32_0 = arith.constant 0 : i32
    %c0_i32_1 = arith.constant 0 : i32
    return %c0_i32, %c0_i32_0 : i32, i32
  }
  func.func @transform_2(%arg0: i32) -> (i32, i32) {
    %c0_i32 = arith.constant 0 : i32
    %c0_i32_0 = arith.constant 0 : i32
    %c0_i32_1 = arith.constant 0 : i32
    return %c0_i32, %c0_i32_0 : i32, i32
  }
  func.func @transform_3(%arg0: i32) -> (i32, i32, i32) {
    %c0_i32 = arith.constant 0 : i32
    %c0_i32_0 = arith.constant 0 : i32
    %c0_i32_1 = arith.constant 0 : i32
    %c0_i32_2 = arith.constant 0 : i32
    return %c0_i32, %c0_i32_0, %c0_i32_1 : i32, i32, i32
  }
  func.func @transform_4(%arg0: i32) -> (i32, i32, i32) {
    %c0_i32 = arith.constant 0 : i32
    %c0_i32_0 = arith.constant 0 : i32
    %c0_i32_1 = arith.constant 0 : i32
    %c0_i32_2 = arith.constant 0 : i32
    return %c0_i32, %c0_i32_0, %c0_i32_1 : i32, i32, i32
  }
  func.func @transform_5(%arg0: i32) -> (i32, i32) {
    %c0_i32 = arith.constant 0 : i32
    %c0_i32_0 = arith.constant 0 : i32
    %c0_i32_1 = arith.constant 0 : i32
    return %c0_i32, %c0_i32_0 : i32, i32
  }
  func.func @transform_6(%arg0: i32) -> (i32, i32) {
    %c0_i32 = arith.constant 0 : i32
    %c0_i32_0 = arith.constant 0 : i32
    %c0_i32_1 = arith.constant 0 : i32
    return %c0_i32, %c0_i32_0 : i32, i32
  }
  func.func @transform_7(%arg0: i32) -> (i32, i32) {
    %c0_i32 = arith.constant 0 : i32
    %c0_i32_0 = arith.constant 0 : i32
    return %arg0, %c0_i32 : i32, i32
  }
}

</mosaic_0001>

<bundles_post_ra>
// kernel: fully_connected_continuous_2.1
= control target key start
LH: loop header
LB: loop body
LE: loop exit
PB: predicated region body
PF: predicated region fallthrough
CT: control target
= control target key end

     0   :  { %12 = vsyncpa [#allocation3], 0  ;;  %s2048_s0 = inlined_call_operand.vmem [shape: bf16[16,128], index: 0, kind: input, shape index: {}]   ;;  %s2049_s1 = inlined_call_operand.hbm [shape: bf16[128,256], index: 1, kind: input, shape index: {}]   ;;  %s2050_s2 = inlined_call_operand.vmem [shape: f32[1,256], index: 2, kind: input, shape index: {}]   ;;  %s2051_s3 = inlined_call_operand.hbm [shape: bf16[4,256,256], index: 3, kind: input, shape index: {}]   ;;  %s2052_s4 = inlined_call_operand.vmem [shape: f32[4,1,256], index: 4, kind: input, shape index: {}]   ;;  %s2053_s5 = inlined_call_operand.hbm [shape: bf16[256,128], index: 5, kind: input, shape index: {}]   ;;  %s2054_s6 = inlined_call_operand.vmem [shape: f32[1,128], index: 6, kind: input, shape index: {}]   ;;  %s2055_s7 = inlined_call_operand.vmem [shape: bf16[16,128], index: 7, kind: output, shape index: {}]  }
   0x1   :  { %13 = vsyncpa [#allocation5], 0  ;;  %s1942_s24 = smov [#allocation4]   ;;  %s1943_s26 = smov [#allocation2]  }
   0x2   :  { %s35_s25 = sshll.u32 %s1942_s24, 4  ;;  %s21_s27 = sshll.u32 %s1943_s26, 4  ;;  %s36_s25 = int_to_ptr.vmem [resolvable:$true] %s35_s25  ;;  %s22_s27 = int_to_ptr.vmem [resolvable:$true] %s21_s27 }
   0x3   :  { %s1886_s28 = scalar_lea.vmem %s36_s25, 16384  ;;  %p1891_p1 = scmp.lt.s32.totalorder %s36_s25, %s36_s25 }
   0x4   :  { %p1887_p0 = scmp.ne.s32.totalorder %s36_s25, %s1886_s28  ;;  %p1892_p2 = scmp.lt.s32.totalorder %s1886_s28, %s1886_s28 }
   0x6   :  { %p1893_p3 = por %p1892_p2, %p1891_p1 }
   0x8   :  { %p1894_p4 = pnand %p1893_p3, %p1887_p0 }
   0xa   :  { %1897 = shalt.err (!%p1894_p4)
}
   0xb   :  { %s1944_s29 = smov 128   ;;  %s1945_s30 = smov 8  }
   0xc   :  { %41 = dma.hbm_to_vmem [thread:$0]  %s2051_s3, 16384, %s36_s25, [#allocation5], %s1944_s29, %s1944_s29, %s1945_s30  }
   0xd   :  { %s1906_s10 = scalar_lea.vmem %s22_s27, 2048  ;;  %p1911_p6 = scmp.lt.s32.totalorder %s22_s27, %s22_s27 }
   0xe   :  { %p1907_p5 = scmp.ne.s32.totalorder %s22_s27, %s1906_s10  ;;  %p1912_p7 = scmp.lt.s32.totalorder %s1906_s10, %s1906_s10 }
  0x10   :  { %p1913_p8 = por %p1912_p7, %p1911_p6 }
  0x12   :  { %p1914_p9 = pnand %p1913_p8, %p1907_p5 }
  0x14   :  { %1917 = shalt.err (!%p1914_p9)
}
  0x15   :  { %27 = dma.hbm_to_vmem [thread:$0]  %s2049_s1, 2048, %s22_s27, [#allocation3], %s1944_s29, %s1944_s29, %s1945_s30  }
  0x16   :  { %s1946_s13 = smov [#allocation6]  }
  0x17   :  { %s49_s14 = sshll.u32 %s1946_s13, 4  ;;  %s50_s14 = int_to_ptr.vmem [resolvable:$true] %s49_s14 }
  0x18   :  { %s1926_s15 = scalar_lea.vmem %s50_s14, 2048  ;;  %p1931_p11 = scmp.lt.s32.totalorder %s50_s14, %s50_s14 }
  0x19   :  { %p1927_p10 = scmp.ne.s32.totalorder %s50_s14, %s1926_s15  ;;  %p1932_p12 = scmp.lt.s32.totalorder %s1926_s15, %s1926_s15 }
  0x1b   :  { %p1933_p13 = por %p1932_p12, %p1931_p11 }
  0x1d   :  { %p1934_p0 = pnand %p1933_p13, %p1927_p10 }
  0x1f   :  { %1937 = shalt.err (!%p1934_p0)
}
  0x20   :  { %s1947_s3 = smov 64   ;;  %s1948_s16 = smov 4  }
  0x21   :  { %55 = dma.hbm_to_vmem [thread:$0]  %s2053_s5, 2048, %s50_s14, [#allocation5], %s1947_s3, %s1947_s3, %s1948_s16  }
  0x22   :  { %1938 = dma.done.wait [#allocation3], 2048  }
  0x23   :  { %1939 = vsyncadd [#allocation3], 4294965248 }
  0x24   :  { %1940 = dma.done.wait [#allocation5], 18432  }
  0x25   :  { %1941 = vsyncadd [#allocation5], 4294948864  ;;  %v1949_v0 = vmov 0   ;;  %v1641_v1 = vld [vmem:[#allocation2 + $0x74] ss:$8 sps:$4 sm:$0xff]   ;;  %v1665_v27 = vld [vmem:[%s2048_s0] sm:$0xff]  }
  0x26   :  { %216 = vmatprep.mubr.bf16.mxu0 %v1949_v0  ;;  %v1643_v2 = vld [vmem:[#allocation2 + $0x70] ss:$8 sps:$4 sm:$0xff]   ;;  %184 = vmatprep.subr.bf16.mxu0 %v1641_v1  ;;  %v1644_v3 = vld [vmem:[#allocation2 + $0x64] ss:$8 sps:$4 sm:$0xff]   ;;  %v1646_v4 = vld [vmem:[#allocation2 + $0x60] ss:$8 sps:$4 sm:$0xff]  }
  0x27   :  { %185 = vmatpush1.bf16.msra.mxu0 %v1643_v2  ;;  %v1647_v5 = vld [vmem:[#allocation2 + $0x54] ss:$8 sps:$4 sm:$0xff]   ;;  %v1649_v6 = vld [vmem:[#allocation2 + $0x50] ss:$8 sps:$4 sm:$0xff]   ;;  %v1650_v7 = vld [vmem:[#allocation2 + $0x44] ss:$8 sps:$4 sm:$0xff]  }
  0x28   :  { %186 = vmatprep.subr.bf16.mxu0 %v1644_v3  ;;  %v1652_v8 = vld [vmem:[#allocation2 + $0x40] ss:$8 sps:$4 sm:$0xff]   ;;  %v1653_v9 = vld [vmem:[#allocation2 + $0x34] ss:$8 sps:$4 sm:$0xff]   ;;  %v1668_v11 = vld [vmem:[#allocation4 + $0x70] ss:$8 sps:$4 sm:$0xff]  }
  0x29   :  { %v1666_v10 = vld [vmem:[#allocation4 + $0x74] ss:$8 sps:$4 sm:$0xff]   ;;  %v1669_v12 = vld [vmem:[#allocation4 + $0x64] ss:$8 sps:$4 sm:$0xff]   ;;  %v1655_v13 = vld [vmem:[#allocation2 + $0x30] ss:$8 sps:$4 sm:$0xff]  }
  0x2a   :  { %435 = vmatprep.subr.bf16.mxu1 %v1666_v10  ;;  %v1671_v14 = vld [vmem:[#allocation4 + $0x60] ss:$8 sps:$4 sm:$0xff]   ;;  %v1656_v15 = vld [vmem:[#allocation2 + $0x24] ss:$8 sps:$4 sm:$0xff]   ;;  %v1672_v16 = vld [vmem:[#allocation4 + $0x54] ss:$8 sps:$4 sm:$0xff]  }
  0x2b   :  { %187 = vmatpush1.bf16.msra.mxu0 %v1646_v4  ;;  %436 = vmatpush1.bf16.msra.mxu1 %v1668_v11  ;;  %v1658_v17 = vld [vmem:[#allocation2 + $0x20] ss:$8 sps:$4 sm:$0xff]   ;;  %v1674_v18 = vld [vmem:[#allocation4 + $0x50] ss:$8 sps:$4 sm:$0xff]   ;;  %v1659_v19 = vld [vmem:[#allocation2 + $0x14] ss:$8 sps:$4 sm:$0xff]  }
  0x2c   :  { %188 = vmatprep.subr.bf16.mxu0 %v1647_v5  ;;  %437 = vmatprep.subr.bf16.mxu1 %v1669_v12  ;;  %v1675_v20 = vld [vmem:[#allocation4 + $0x44] ss:$8 sps:$4 sm:$0xff]   ;;  %v1661_v21 = vld [vmem:[#allocation2 + $0x10] ss:$8 sps:$4 sm:$0xff]   ;;  %v1677_v22 = vld [vmem:[#allocation4 + $0x40] ss:$8 sps:$4 sm:$0xff]  }
  0x2d   :  { %v1662_v23 = vld [vmem:[#allocation2 + $0x4] ss:$8 sps:$4 sm:$0xff]   ;;  %v1678_v24 = vld [vmem:[#allocation4 + $0x34] ss:$8 sps:$4 sm:$0xff]   ;;  %v1664_v25 = vld [vmem:[#allocation2] ss:$8 sps:$4 sm:$0xff]  }
  0x2e   :  { %v1680_v26 = vld [vmem:[#allocation4 + $0x30] ss:$8 sps:$4 sm:$0xff]   ;;  %v1681_v28 = vld [vmem:[#allocation4 + $0x24] ss:$8 sps:$4 sm:$0xff]   ;;  %v1683_v29 = vld [vmem:[#allocation4 + $0x20] ss:$8 sps:$4 sm:$0xff]  }
  0x2f   :  { %189 = vmatpush1.bf16.msra.mxu0 %v1649_v6  ;;  %438 = vmatpush1.bf16.msra.mxu1 %v1671_v14  ;;  %v1684_v30 = vld [vmem:[#allocation4 + $0x14] ss:$8 sps:$4 sm:$0xff]   ;;  %v1686_v31 = vld [vmem:[#allocation4 + $0x10] ss:$8 sps:$4 sm:$0xff]   ;;  %v1687_v32 = vld [vmem:[#allocation4 + $0x4] ss:$8 sps:$4 sm:$0xff]  }
  0x30   :  { %190 = vmatprep.subr.bf16.mxu0 %v1650_v7  ;;  %439 = vmatprep.subr.bf16.mxu1 %v1672_v16  ;;  %v1689_v33 = vld [vmem:[#allocation4] ss:$8 sps:$4 sm:$0xff]   ;;  %v1690_v34 = vld [vmem:[#allocation4 + $0xf4] ss:$8 sps:$4 sm:$0xff]   ;;  %v1692_v35 = vld [vmem:[#allocation4 + $0xf0] ss:$8 sps:$4 sm:$0xff]  }
  0x31   :  { %v1693_v36 = vld [vmem:[#allocation4 + $0xe4] ss:$8 sps:$4 sm:$0xff]   ;;  %v1695_v37 = vld [vmem:[#allocation4 + $0xe0] ss:$8 sps:$4 sm:$0xff]   ;;  %v1696_v38 = vld [vmem:[#allocation4 + $0xd4] ss:$8 sps:$4 sm:$0xff]  }
  0x32   :  { %v1698_v39 = vld [vmem:[#allocation4 + $0xd0] ss:$8 sps:$4 sm:$0xff]   ;;  %v1699_v40 = vld [vmem:[#allocation4 + $0xc4] ss:$8 sps:$4 sm:$0xff]   ;;  %v1701_v41 = vld [vmem:[#allocation4 + $0xc0] ss:$8 sps:$4 sm:$0xff]  }
  0x33   :  { %191 = vmatpush1.bf16.msra.mxu0 %v1652_v8  ;;  %440 = vmatpush1.bf16.msra.mxu1 %v1674_v18  ;;  %v1702_v42 = vld [vmem:[#allocation4 + $0xb4] ss:$8 sps:$4 sm:$0xff]   ;;  %v1704_v43 = vld [vmem:[#allocation4 + $0xb0] ss:$8 sps:$4 sm:$0xff]   ;;  %v1705_v44 = vld [vmem:[#allocation4 + $0xa4] ss:$8 sps:$4 sm:$0xff]  }
  0x34   :  { %192 = vmatprep.subr.bf16.mxu0 %v1653_v9  ;;  %441 = vmatprep.subr.bf16.mxu1 %v1675_v20  ;;  %v1707_v45 = vld [vmem:[#allocation4 + $0xa0] ss:$8 sps:$4 sm:$0xff]   ;;  %v1708_v46 = vld [vmem:[#allocation4 + $0x94] ss:$8 sps:$4 sm:$0xff]   ;;  %v1710_v47 = vld [vmem:[#allocation4 + $0x90] ss:$8 sps:$4 sm:$0xff]  }
  0x35   :  { %v1711_v48 = vld [vmem:[#allocation4 + $0x84] ss:$8 sps:$4 sm:$0xff]   ;;  %v1713_v49 = vld [vmem:[#allocation4 + $0x80] ss:$8 sps:$4 sm:$0xff]   ;;  %v1714_v50 = vld [vmem:[#allocation4 + $0x170] ss:$8 sps:$4 sm:$0xff]  }
  0x36   :  { %v1716_v51 = vld [vmem:[#allocation4 + $0x174] ss:$8 sps:$4 sm:$0xff]   ;;  %v1719_v52 = vld [vmem:[#allocation4 + $0x164] ss:$8 sps:$4 sm:$0xff]   ;;  %v1717_v53 = vld [vmem:[#allocation4 + $0x160] ss:$8 sps:$4 sm:$0xff]  }
  0x37   :  { %193 = vmatpush1.bf16.msra.mxu0 %v1655_v13  ;;  %442 = vmatpush1.bf16.msra.mxu1 %v1677_v22  ;;  %v1722_v54 = vld [vmem:[#allocation4 + $0x154] ss:$8 sps:$4 sm:$0xff]   ;;  %v1720_v55 = vld [vmem:[#allocation4 + $0x150] ss:$8 sps:$4 sm:$0xff]   ;;  %v1725_v56 = vld [vmem:[#allocation4 + $0x144] ss:$8 sps:$4 sm:$0xff]   ;;  %v88_v13 = vlaneseq }
  0x38   :  { %194 = vmatprep.subr.bf16.mxu0 %v1656_v15  ;;  %443 = vmatprep.subr.bf16.mxu1 %v1678_v24  ;;  %v1723_v57 = vld [vmem:[#allocation4 + $0x140] ss:$8 sps:$4 sm:$0xff]   ;;  %v1728_v58 = vld [vmem:[#allocation4 + $0x134] ss:$8 sps:$4 sm:$0xff]   ;;  %v1726_v59 = vld [vmem:[#allocation4 + $0x130] ss:$8 sps:$4 sm:$0xff]  }
  0x39   :  { %v1731_v60 = vld [vmem:[#allocation4 + $0x124] ss:$8 sps:$4 sm:$0xff]   ;;  %v1729_v61 = vld [vmem:[#allocation4 + $0x120] ss:$8 sps:$4 sm:$0xff]   ;;  %v1734_v62 = vld [vmem:[#allocation4 + $0x114] ss:$8 sps:$4 sm:$0xff]  }
  0x3a   :  { %v1732_v63 = vld [vmem:[#allocation4 + $0x110] ss:$8 sps:$4 sm:$0xff]   ;;  %v1737_v1 = vld [vmem:[#allocation4 + $0x104] ss:$8 sps:$4 sm:$0xff]   ;;  %v1735_v2 = vld [vmem:[#allocation4 + $0x100] ss:$8 sps:$4 sm:$0xff]  }
  0x3b   :  { %195 = vmatpush1.bf16.msra.mxu0 %v1658_v17  ;;  %444 = vmatpush1.bf16.msra.mxu1 %v1680_v26  ;;  %v1740_v3 = vld [vmem:[#allocation4 + $0x1f4] ss:$8 sps:$4 sm:$0xff]   ;;  %v1738_v4 = vld [vmem:[#allocation4 + $0x1f0] ss:$8 sps:$4 sm:$0xff]   ;;  %v1743_v5 = vld [vmem:[#allocation4 + $0x1e4] ss:$8 sps:$4 sm:$0xff]  }
  0x3c   :  { %196 = vmatprep.subr.bf16.mxu0 %v1659_v19  ;;  %445 = vmatprep.subr.bf16.mxu1 %v1681_v28  ;;  %v1741_v6 = vld [vmem:[#allocation4 + $0x1e0] ss:$8 sps:$4 sm:$0xff]   ;;  %v1746_v7 = vld [vmem:[#allocation4 + $0x1d4] ss:$8 sps:$4 sm:$0xff]   ;;  %v1744_v8 = vld [vmem:[#allocation4 + $0x1d0] ss:$8 sps:$4 sm:$0xff]  }
  0x3d   :  { %v1749_v9 = vld [vmem:[#allocation4 + $0x1c4] ss:$8 sps:$4 sm:$0xff]   ;;  %v1747_v10 = vld [vmem:[#allocation4 + $0x1c0] ss:$8 sps:$4 sm:$0xff]   ;;  %v1752_v11 = vld [vmem:[#allocation4 + $0x1b4] ss:$8 sps:$4 sm:$0xff]  }
  0x3e   :  { %v1750_v12 = vld [vmem:[#allocation4 + $0x1b0] ss:$8 sps:$4 sm:$0xff]   ;;  %v89_v14 = vshrl.u32 %v88_v13, 7  ;;  %v86_v16 = vld [vmem:[%s2050_s2] sm:$0x3] }
  0x3f   :  { %197 = vmatpush1.bf16.msra.mxu0 %v1661_v21  ;;  %446 = vmatpush1.bf16.msra.mxu1 %v1683_v29 }
  0x40   :  { %198 = vmatprep.subr.bf16.mxu0 %v1662_v23  ;;  %447 = vmatprep.subr.bf16.mxu1 %v1684_v30  ;;  %v2003_v15 = vsub.s32 0, %v89_v14  ;;  %v2008_v17 = vsub.s32 1, %v89_v14 }
  0x42   :  { %v91_v19 = vrot.slane %v86_v16, %v2003_v15  ;;  %v95_v21 = vrot.slane %v86_v16, %v2008_v17 }
  0x43   :  { %199 = vmatpush1.bf16.msra.mxu0 %v1664_v25  ;;  %448 = vmatpush1.bf16.msra.mxu1 %v1686_v31 }
  0x44   :  { %449 = vmatprep.subr.bf16.mxu1 %v1687_v32  ;;  %688 = vmatprep.subr.bf16.mxu0 %v1716_v51  ;;  %v1755_v32 = vld [vmem:[#allocation4 + $0x1a4] ss:$8 sps:$4 sm:$0xff]   ;;  %v1780_v51 = vld [vmem:[#allocation4 + $0x210] ss:$8 sps:$4 sm:$0xff]  }
  0x46   :  { %217 = vmatmul.mubr.bf16.vlgmr.msra.gmra.mxu0 %v1665_v27 }
  0x47   :  { %450 = vmatpush1.bf16.msra.mxu1 %v1689_v33  ;;  %689 = vmatpush1.bf16.msra.mxu0 %v1714_v50  ;;  %v1753_v33 = vld [vmem:[#allocation4 + $0x1a0] ss:$8 sps:$4 sm:$0xff]   ;;  %v1782_v50 = vld [vmem:[#allocation4 + $0x214] ss:$8 sps:$4 sm:$0xff]  }
  0x48   :  { %451 = vmatprep.subr.bf16.mxu1 %v1690_v34  ;;  %690 = vmatprep.subr.bf16.mxu0 %v1719_v52  ;;  %v1758_v34 = vld [vmem:[#allocation4 + $0x194] ss:$8 sps:$4 sm:$0xff]   ;;  %v1785_v52 = vld [vmem:[#allocation4 + $0x204] ss:$8 sps:$4 sm:$0xff]  }
  0x4b   :  { %452 = vmatpush2.bf16.msra.mxu1 %v1692_v35  ;;  %691 = vmatpush1.bf16.msra.mxu0 %v1717_v53  ;;  %v1756_v35 = vld [vmem:[#allocation4 + $0x190] ss:$8 sps:$4 sm:$0xff]   ;;  %v1783_v53 = vld [vmem:[#allocation4 + $0x200] ss:$8 sps:$4 sm:$0xff]  }
  0x4c   :  { %453 = vmatprep.subr.bf16.mxu1 %v1693_v36  ;;  %692 = vmatprep.subr.bf16.mxu0 %v1722_v54  ;;  %v1761_v36 = vld [vmem:[#allocation4 + $0x184] ss:$8 sps:$4 sm:$0xff]   ;;  %v1788_v54 = vld [vmem:[#allocation4 + $0x2f4] ss:$8 sps:$4 sm:$0xff]  }
  0x4f   :  { %454 = vmatpush2.bf16.msra.mxu1 %v1695_v37  ;;  %693 = vmatpush1.bf16.msra.mxu0 %v1720_v55  ;;  %v1759_v37 = vld [vmem:[#allocation4 + $0x180] ss:$8 sps:$4 sm:$0xff]   ;;  %v1786_v55 = vld [vmem:[#allocation4 + $0x2f0] ss:$8 sps:$4 sm:$0xff]  }
  0x50   :  { %455 = vmatprep.subr.bf16.mxu1 %v1696_v38  ;;  %694 = vmatprep.subr.bf16.mxu0 %v1725_v56  ;;  %v1762_v38 = vld [vmem:[#allocation4 + $0x270] ss:$8 sps:$4 sm:$0xff]   ;;  %v1791_v56 = vld [vmem:[#allocation4 + $0x2e4] ss:$8 sps:$4 sm:$0xff]  }
  0x53   :  { %456 = vmatpush2.bf16.msra.mxu1 %v1698_v39  ;;  %695 = vmatpush1.bf16.msra.mxu0 %v1723_v57  ;;  %v1764_v39 = vld [vmem:[#allocation4 + $0x274] ss:$8 sps:$4 sm:$0xff]   ;;  %v1789_v57 = vld [vmem:[#allocation4 + $0x2e0] ss:$8 sps:$4 sm:$0xff]  }
  0x54   :  { %457 = vmatprep.subr.bf16.mxu1 %v1699_v40  ;;  %696 = vmatprep.subr.bf16.mxu0 %v1728_v58  ;;  %v1767_v40 = vld [vmem:[#allocation4 + $0x264] ss:$8 sps:$4 sm:$0xff]   ;;  %v1794_v58 = vld [vmem:[#allocation4 + $0x2d4] ss:$8 sps:$4 sm:$0xff]  }
  0x57   :  { %458 = vmatpush2.bf16.msra.mxu1 %v1701_v41  ;;  %697 = vmatpush1.bf16.msra.mxu0 %v1726_v59  ;;  %v1765_v41 = vld [vmem:[#allocation4 + $0x260] ss:$8 sps:$4 sm:$0xff]   ;;  %v1792_v59 = vld [vmem:[#allocation4 + $0x2d0] ss:$8 sps:$4 sm:$0xff]  }
  0x58   :  { %459 = vmatprep.subr.bf16.mxu1 %v1702_v42  ;;  %698 = vmatprep.subr.bf16.mxu0 %v1731_v60  ;;  %v1770_v42 = vld [vmem:[#allocation4 + $0x254] ss:$8 sps:$4 sm:$0xff]   ;;  %v1797_v60 = vld [vmem:[#allocation4 + $0x2c4] ss:$8 sps:$4 sm:$0xff]  }
  0x5b   :  { %460 = vmatpush2.bf16.msra.mxu1 %v1704_v43  ;;  %699 = vmatpush1.bf16.msra.mxu0 %v1729_v61  ;;  %v1768_v43 = vld [vmem:[#allocation4 + $0x250] ss:$8 sps:$4 sm:$0xff]   ;;  %v1795_v61 = vld [vmem:[#allocation4 + $0x2c0] ss:$8 sps:$4 sm:$0xff]  }
  0x5c   :  { %461 = vmatprep.subr.bf16.mxu1 %v1705_v44  ;;  %700 = vmatprep.subr.bf16.mxu0 %v1734_v62  ;;  %v1773_v44 = vld [vmem:[#allocation4 + $0x244] ss:$8 sps:$4 sm:$0xff]   ;;  %v1800_v62 = vld [vmem:[#allocation4 + $0x2b4] ss:$8 sps:$4 sm:$0xff]  }
  0x5f   :  { %462 = vmatpush2.bf16.msra.mxu1 %v1707_v45  ;;  %701 = vmatpush1.bf16.msra.mxu0 %v1732_v63  ;;  %v1771_v45 = vld [vmem:[#allocation4 + $0x240] ss:$8 sps:$4 sm:$0xff]   ;;  %v1798_v63 = vld [vmem:[#allocation4 + $0x2b0] ss:$8 sps:$4 sm:$0xff]  }
  0x60   :  { %463 = vmatprep.subr.bf16.mxu1 %v1708_v46  ;;  %702 = vmatprep.subr.bf16.mxu0 %v1737_v1  ;;  %v1776_v46 = vld [vmem:[#allocation4 + $0x234] ss:$8 sps:$4 sm:$0xff]   ;;  %v263_v1 = vld [vmem:[%s2052_s4] sm:$0x3] }
  0x63   :  { %464 = vmatpush2.bf16.msra.mxu1 %v1710_v47  ;;  %703 = vmatpush1.bf16.msra.mxu0 %v1735_v2  ;;  %v1774_v47 = vld [vmem:[#allocation4 + $0x230] ss:$8 sps:$4 sm:$0xff]  }
  0x64   :  { %465 = vmatprep.subr.bf16.mxu1 %v1711_v48  ;;  %704 = vmatprep.subr.bf16.mxu0 %v1740_v3  ;;  %v1779_v48 = vld [vmem:[#allocation4 + $0x224] ss:$8 sps:$4 sm:$0xff]   ;;  %v268_v3 = vrot.slane %v263_v1, %v2003_v15 }
  0x67   :  { %466 = vmatpush2.bf16.msra.mxu1 %v1713_v49  ;;  %705 = vmatpush2.bf16.msra.mxu0 %v1738_v4  ;;  %v1777_v49 = vld [vmem:[#allocation4 + $0x220] ss:$8 sps:$4 sm:$0xff]  }
  0x68   :  { %706 = vmatprep.subr.bf16.mxu0 %v1743_v5  ;;  %941 = vmatprep.subr.bf16.mxu1 %v1764_v39  ;;  %v272_v5 = vrot.slane %v263_v1, %v2008_v17  ;;  %v1831_v39 = vld [vmem:[#allocation4 + $0x300] ss:$8 sps:$4 sm:$0xff]  }
  0x6b   :  { %707 = vmatpush2.bf16.msra.mxu0 %v1741_v6 }
  0x6c   :  { %708 = vmatprep.subr.bf16.mxu0 %v1746_v7 }
  0x6f   :  { %709 = vmatpush2.bf16.msra.mxu0 %v1744_v8 }
  0x70   :  { %710 = vmatprep.subr.bf16.mxu0 %v1749_v9 }
  0x73   :  { %711 = vmatpush2.bf16.msra.mxu0 %v1747_v10 }
  0x74   :  { %712 = vmatprep.subr.bf16.mxu0 %v1752_v11 }
  0x77   :  { %713 = vmatpush2.bf16.msra.mxu0 %v1750_v12 }
  0x78   :  { %714 = vmatprep.subr.bf16.mxu0 %v1755_v32  ;;  %v1824_v32 = vld [vmem:[#allocation4 + $0x334] ss:$8 sps:$4 sm:$0xff]  }
  0x7b   :  { %715 = vmatpush2.bf16.msra.mxu0 %v1753_v33  ;;  %v1822_v33 = vld [vmem:[#allocation4 + $0x330] ss:$8 sps:$4 sm:$0xff]  }
  0x7c   :  { %716 = vmatprep.subr.bf16.mxu0 %v1758_v34  ;;  %v1827_v34 = vld [vmem:[#allocation4 + $0x324] ss:$8 sps:$4 sm:$0xff]  }
  0x7f   :  { %717 = vmatpush2.bf16.msra.mxu0 %v1756_v35  ;;  %v1825_v35 = vld [vmem:[#allocation4 + $0x320] ss:$8 sps:$4 sm:$0xff]  }
  0x80   :  { %718 = vmatprep.subr.bf16.mxu0 %v1761_v36  ;;  %v1830_v36 = vld [vmem:[#allocation4 + $0x314] ss:$8 sps:$4 sm:$0xff]  }
  0x83   :  { %719 = vmatpush2.bf16.msra.mxu0 %v1759_v37  ;;  %v1828_v37 = vld [vmem:[#allocation4 + $0x310] ss:$8 sps:$4 sm:$0xff]  }
 0x106   :  { %v218_v18 = vpop.f32.mrf.mxu0 }
 0x107   :  { %v219_v24 = vadd.f32 %v218_v18, %v91_v19  ;;  %v1803_v18 = vld [vmem:[#allocation4 + $0x2a4] ss:$8 sps:$4 sm:$0xff]  }
 0x108   :  { %v220_v20 = vpop.f32.mrf.mxu0 }
 0x109   :  { %v221_v26 = vadd.f32 %v220_v20, %v95_v21  ;;  %v1806_v20 = vld [vmem:[#allocation4 + $0x294] ss:$8 sps:$4 sm:$0xff]  }
 0x10a   :  { %v222_v22 = vpop.f32.mrf.mxu0 }
 0x10b   :  { %v223_v23 = vadd.f32 %v222_v22, %v91_v19  ;;  %v1801_v19 = vld [vmem:[#allocation4 + $0x2a0] ss:$8 sps:$4 sm:$0xff]   ;;  %v1809_v22 = vld [vmem:[#allocation4 + $0x284] ss:$8 sps:$4 sm:$0xff]  }
 0x10c   :  { %v224_v25 = vpop.f32.mrf.mxu0 }
 0x10d   :  { %v225_v27 = vadd.f32 %v224_v25, %v95_v21  ;;  %v227_v28 = vpack.c.bf16 %v223_v23, %v219_v24  ;;  %v1804_v21 = vld [vmem:[#allocation4 + $0x290] ss:$8 sps:$4 sm:$0xff]   ;;  %v1807_v23 = vld [vmem:[#allocation4 + $0x280] ss:$8 sps:$4 sm:$0xff]   ;;  %v1812_v25 = vld [vmem:[#allocation4 + $0x374] ss:$8 sps:$4 sm:$0xff]  }
 0x10e   :  { %v1810_v24 = vld [vmem:[#allocation4 + $0x370] ss:$8 sps:$4 sm:$0xff]   ;;  %1194 = vmatprep.subr.bf16.mxu0 %v1812_v25 }
 0x10f   :  { %v228_v29 = vpack.c.bf16 %v225_v27, %v221_v26  ;;  %v229_v31 = vmax.bf16 %v1949_v0, %v227_v28  ;;  %v1815_v26 = vld [vmem:[#allocation4 + $0x364] ss:$8 sps:$4 sm:$0xff]   ;;  %v1813_v27 = vld [vmem:[#allocation4 + $0x360] ss:$8 sps:$4 sm:$0xff]   ;;  %v1818_v28 = vld [vmem:[#allocation4 + $0x354] ss:$8 sps:$4 sm:$0xff]  }
 0x111   :  { %v230_v30 = vmax.bf16 %v1949_v0, %v228_v29  ;;  %v1816_v29 = vld [vmem:[#allocation4 + $0x350] ss:$8 sps:$4 sm:$0xff]  }
 0x113   :  { %467 = vmatprep.mubr.bf16.mxu1 %v230_v30  ;;  %v1821_v30 = vld [vmem:[#allocation4 + $0x344] ss:$8 sps:$4 sm:$0xff]  }
 0x114   :  { %468 = vmatmul.mubr.bf16.vlgmr.msra.gmra.mxu1 %v229_v31  ;;  %v1819_v31 = vld [vmem:[#allocation4 + $0x340] ss:$8 sps:$4 sm:$0xff]  }
 0x115   :  { %942 = vmatpush1.bf16.msra.mxu1 %v1762_v38  ;;  %v1833_v38 = vld [vmem:[#allocation4 + $0x304] ss:$8 sps:$4 sm:$0xff]  }
 0x116   :  { %943 = vmatprep.subr.bf16.mxu1 %v1767_v40  ;;  %v1836_v40 = vld [vmem:[#allocation4 + $0x3f4] ss:$8 sps:$4 sm:$0xff]  }
 0x119   :  { %944 = vmatpush1.bf16.msra.mxu1 %v1765_v41  ;;  %v1834_v41 = vld [vmem:[#allocation4 + $0x3f0] ss:$8 sps:$4 sm:$0xff]  }
 0x11a   :  { %945 = vmatprep.subr.bf16.mxu1 %v1770_v42  ;;  %v1839_v42 = vld [vmem:[#allocation4 + $0x3e4] ss:$8 sps:$4 sm:$0xff]  }
 0x11d   :  { %946 = vmatpush1.bf16.msra.mxu1 %v1768_v43  ;;  %v1837_v43 = vld [vmem:[#allocation4 + $0x3e0] ss:$8 sps:$4 sm:$0xff]  }
 0x11e   :  { %947 = vmatprep.subr.bf16.mxu1 %v1773_v44  ;;  %v1842_v44 = vld [vmem:[#allocation4 + $0x3d4] ss:$8 sps:$4 sm:$0xff]  }
 0x121   :  { %948 = vmatpush1.bf16.msra.mxu1 %v1771_v45  ;;  %v1840_v45 = vld [vmem:[#allocation4 + $0x3d0] ss:$8 sps:$4 sm:$0xff]  }
 0x122   :  { %949 = vmatprep.subr.bf16.mxu1 %v1776_v46  ;;  %v1845_v46 = vld [vmem:[#allocation4 + $0x3c4] ss:$8 sps:$4 sm:$0xff]  }
 0x125   :  { %950 = vmatpush1.bf16.msra.mxu1 %v1774_v47  ;;  %v1843_v47 = vld [vmem:[#allocation4 + $0x3c0] ss:$8 sps:$4 sm:$0xff]  }
 0x126   :  { %951 = vmatprep.subr.bf16.mxu1 %v1779_v48  ;;  %v1848_v48 = vld [vmem:[#allocation4 + $0x3b4] ss:$8 sps:$4 sm:$0xff]  }
 0x129   :  { %952 = vmatpush1.bf16.msra.mxu1 %v1777_v49  ;;  %v1846_v49 = vld [vmem:[#allocation4 + $0x3b0] ss:$8 sps:$4 sm:$0xff]  }
 0x12a   :  { %953 = vmatprep.subr.bf16.mxu1 %v1782_v50  ;;  %v1486_v50 = vld [vmem:[%s2052_s4 + $0x2] sm:$0x3] }
 0x12d   :  { %954 = vmatpush1.bf16.msra.mxu1 %v1780_v51 }
 0x12e   :  { %955 = vmatprep.subr.bf16.mxu1 %v1785_v52  ;;  %v521_v52 = vrot.slane %v1486_v50, %v2003_v15 }
 0x131   :  { %956 = vmatpush1.bf16.msra.mxu1 %v1783_v53 }
 0x132   :  { %957 = vmatprep.subr.bf16.mxu1 %v1788_v54  ;;  %v525_v54 = vrot.slane %v1486_v50, %v2008_v17 }
 0x135   :  { %958 = vmatpush2.bf16.msra.mxu1 %v1786_v55 }
 0x136   :  { %959 = vmatprep.subr.bf16.mxu1 %v1791_v56 }
 0x139   :  { %960 = vmatpush2.bf16.msra.mxu1 %v1789_v57 }
 0x13a   :  { %961 = vmatprep.subr.bf16.mxu1 %v1794_v58 }
 0x13d   :  { %962 = vmatpush2.bf16.msra.mxu1 %v1792_v59 }
 0x13e   :  { %963 = vmatprep.subr.bf16.mxu1 %v1797_v60 }
 0x141   :  { %964 = vmatpush2.bf16.msra.mxu1 %v1795_v61 }
 0x142   :  { %965 = vmatprep.subr.bf16.mxu1 %v1800_v62 }
 0x145   :  { %966 = vmatpush2.bf16.msra.mxu1 %v1798_v63 }
 0x146   :  { %967 = vmatprep.subr.bf16.mxu1 %v1803_v18  ;;  %v1866_v18 = vld [vmem:[#allocation6 + $0x58] sm:$0xff]  }
 0x149   :  { %968 = vmatpush2.bf16.msra.mxu1 %v1801_v19  ;;  %v1867_v19 = vld [vmem:[#allocation6 + $0x18] sm:$0xff]  }
 0x14a   :  { %969 = vmatprep.subr.bf16.mxu1 %v1806_v20  ;;  %v1519_v20 = vld [vmem:[%s2052_s4 + $0x4] sm:$0x3] }
 0x14d   :  { %970 = vmatpush2.bf16.msra.mxu1 %v1804_v21 }
 0x14e   :  { %971 = vmatprep.subr.bf16.mxu1 %v1809_v22  ;;  %v774_v22 = vrot.slane %v1519_v20, %v2003_v15 }
 0x151   :  { %972 = vmatpush2.bf16.msra.mxu1 %v1807_v23 }
 0x1d4   :  { %v469_v2 = vpop.f32.mrf.mxu1 }
 0x1d5   :  { %v470_v8 = vadd.f32 %v469_v2, %v268_v3  ;;  %v1851_v2 = vld [vmem:[#allocation4 + $0x3a4] ss:$8 sps:$4 sm:$0xff]  }
 0x1d6   :  { %v471_v4 = vpop.f32.mrf.mxu1 }
 0x1d7   :  { %v472_v10 = vadd.f32 %v471_v4, %v272_v5  ;;  %v1854_v4 = vld [vmem:[#allocation4 + $0x394] ss:$8 sps:$4 sm:$0xff]  }
 0x1d8   :  { %v473_v6 = vpop.f32.mrf.mxu1 }
 0x1d9   :  { %v474_v7 = vadd.f32 %v473_v6, %v268_v3  ;;  %v1849_v3 = vld [vmem:[#allocation4 + $0x3a0] ss:$8 sps:$4 sm:$0xff]   ;;  %v1857_v6 = vld [vmem:[#allocation4 + $0x384] ss:$8 sps:$4 sm:$0xff]  }
 0x1da   :  { %v475_v9 = vpop.f32.mrf.mxu1 }
 0x1db   :  { %v476_v11 = vadd.f32 %v475_v9, %v272_v5  ;;  %v478_v12 = vpack.c.bf16 %v474_v7, %v470_v8  ;;  %v1852_v5 = vld [vmem:[#allocation4 + $0x390] ss:$8 sps:$4 sm:$0xff]   ;;  %v1855_v7 = vld [vmem:[#allocation4 + $0x380] ss:$8 sps:$4 sm:$0xff]  }
 0x1dc   :  { %v1858_v8 = vld [vmem:[#allocation6 + $0x78] sm:$0xff]  }
 0x1dd   :  { %v479_v13 = vpack.c.bf16 %v476_v11, %v472_v10  ;;  %v480_v16 = vmax.bf16 %v1949_v0, %v478_v12  ;;  %v1859_v9 = vld [vmem:[#allocation6 + $0x38] sm:$0xff]   ;;  %v1860_v10 = vld [vmem:[#allocation6 + $0x70] sm:$0xff]   ;;  %1611 = vmatprep.subr.bf16.mxu1 %v1858_v8  ;;  %v1862_v12 = vld [vmem:[#allocation6 + $0x68] sm:$0xff]  }
 0x1de   :  { %v1861_v11 = vld [vmem:[#allocation6 + $0x30] sm:$0xff]  }
 0x1df   :  { %v481_v14 = vmax.bf16 %v1949_v0, %v479_v13  ;;  %v1863_v13 = vld [vmem:[#allocation6 + $0x28] sm:$0xff]  }
 0x1e1   :  { %720 = vmatprep.mubr.bf16.mxu0 %v481_v14  ;;  %v1864_v14 = vld [vmem:[#allocation6 + $0x60] sm:$0xff]  }
 0x1e2   :  { %721 = vmatmul.mubr.bf16.vlgmr.msra.gmra.mxu0 %v480_v16  ;;  %v1865_v16 = vld [vmem:[#allocation6 + $0x20] sm:$0xff]  }
 0x1e3   :  { %1195 = vmatpush1.bf16.msra.mxu0 %v1810_v24  ;;  %v778_v24 = vrot.slane %v1519_v20, %v2008_v17 }
 0x1e4   :  { %1196 = vmatprep.subr.bf16.mxu0 %v1815_v26 }
 0x1e7   :  { %1197 = vmatpush1.bf16.msra.mxu0 %v1813_v27 }
 0x1e8   :  { %1198 = vmatprep.subr.bf16.mxu0 %v1818_v28 }
 0x1eb   :  { %1199 = vmatpush1.bf16.msra.mxu0 %v1816_v29 }
 0x1ec   :  { %1200 = vmatprep.subr.bf16.mxu0 %v1821_v30 }
 0x1ef   :  { %1201 = vmatpush1.bf16.msra.mxu0 %v1819_v31 }
 0x1f0   :  { %1202 = vmatprep.subr.bf16.mxu0 %v1824_v32 }
 0x1f3   :  { %1203 = vmatpush1.bf16.msra.mxu0 %v1822_v33 }
 0x1f4   :  { %1204 = vmatprep.subr.bf16.mxu0 %v1827_v34 }
 0x1f7   :  { %1205 = vmatpush1.bf16.msra.mxu0 %v1825_v35  ;;  %v1868_v35 = vld [vmem:[#allocation6 + $0x50] sm:$0xff]  }
 0x1f8   :  { %1206 = vmatprep.subr.bf16.mxu0 %v1830_v36  ;;  %v1869_v36 = vld [vmem:[#allocation6 + $0x10] sm:$0xff]  }
 0x1fb   :  { %1207 = vmatpush1.bf16.msra.mxu0 %v1828_v37  ;;  %v1870_v37 = vld [vmem:[#allocation6 + $0x48] sm:$0xff]  }
 0x1fc   :  { %1208 = vmatprep.subr.bf16.mxu0 %v1833_v38  ;;  %v1871_v38 = vld [vmem:[#allocation6 + $0x8] sm:$0xff]  }
 0x1ff   :  { %1209 = vmatpush1.bf16.msra.mxu0 %v1831_v39  ;;  %v1872_v39 = vld [vmem:[#allocation6 + $0x40] sm:$0xff]  }
 0x200   :  { %1210 = vmatprep.subr.bf16.mxu0 %v1836_v40  ;;  %v1873_v40 = vld [vmem:[#allocation6] sm:$0xff]  }
 0x203   :  { %1211 = vmatpush2.bf16.msra.mxu0 %v1834_v41  ;;  %v1552_v41 = vld [vmem:[%s2052_s4 + $0x6] sm:$0x3] }
 0x204   :  { %1212 = vmatprep.subr.bf16.mxu0 %v1839_v42 }
 0x207   :  { %1213 = vmatpush2.bf16.msra.mxu0 %v1837_v43  ;;  %v1027_v43 = vrot.slane %v1552_v41, %v2003_v15  ;;  %v1585_v15 = vld [vmem:[%s2054_s6] ss:$0 sm:$0xff] }
 0x208   :  { %1214 = vmatprep.subr.bf16.mxu0 %v1842_v44 }
 0x20b   :  { %1215 = vmatpush2.bf16.msra.mxu0 %v1840_v45  ;;  %v1031_v45 = vrot.slane %v1552_v41, %v2008_v17 }
 0x20c   :  { %1216 = vmatprep.subr.bf16.mxu0 %v1845_v46 }
 0x20f   :  { %1217 = vmatpush2.bf16.msra.mxu0 %v1843_v47 }
 0x210   :  { %1218 = vmatprep.subr.bf16.mxu0 %v1848_v48 }
 0x213   :  { %1219 = vmatpush2.bf16.msra.mxu0 %v1846_v49 }
 0x214   :  { %1220 = vmatprep.subr.bf16.mxu0 %v1851_v2 }
 0x217   :  { %1221 = vmatpush2.bf16.msra.mxu0 %v1849_v3 }
 0x218   :  { %1222 = vmatprep.subr.bf16.mxu0 %v1854_v4 }
 0x21b   :  { %1223 = vmatpush2.bf16.msra.mxu0 %v1852_v5 }
 0x21c   :  { %1224 = vmatprep.subr.bf16.mxu0 %v1857_v6 }
 0x21f   :  { %1225 = vmatpush2.bf16.msra.mxu0 %v1855_v7 }
 0x2a2   :  { %v722_v51 = vpop.f32.mrf.mxu0 }
 0x2a3   :  { %v723_v57 = vadd.f32 %v722_v51, %v521_v52 }
 0x2a4   :  { %v724_v53 = vpop.f32.mrf.mxu0 }
 0x2a5   :  { %v725_v59 = vadd.f32 %v724_v53, %v525_v54 }
 0x2a6   :  { %v726_v55 = vpop.f32.mrf.mxu0 }
 0x2a7   :  { %v727_v56 = vadd.f32 %v726_v55, %v521_v52 }
 0x2a8   :  { %v728_v58 = vpop.f32.mrf.mxu0 }
 0x2a9   :  { %v729_v60 = vadd.f32 %v728_v58, %v525_v54  ;;  %v731_v61 = vpack.c.bf16 %v727_v56, %v723_v57 }
 0x2ab   :  { %v732_v62 = vpack.c.bf16 %v729_v60, %v725_v59  ;;  %v733_v1 = vmax.bf16 %v1949_v0, %v731_v61 }
 0x2ad   :  { %v734_v63 = vmax.bf16 %v1949_v0, %v732_v62 }
 0x2af   :  { %973 = vmatprep.mubr.bf16.mxu1 %v734_v63 }
 0x2b0   :  { %974 = vmatmul.mubr.bf16.vlgmr.msra.gmra.mxu1 %v733_v1 }
 0x2b1   :  { %1612 = vmatpush3.bf16.msra.mxu1 %v1859_v9 }
 0x2b2   :  { %1613 = vmatprep.subr.bf16.mxu1 %v1860_v10 }
 0x2b5   :  { %1614 = vmatpush3.bf16.msra.mxu1 %v1861_v11 }
 0x2b6   :  { %1615 = vmatprep.subr.bf16.mxu1 %v1862_v12 }
 0x2b9   :  { %1616 = vmatpush3.bf16.msra.mxu1 %v1863_v13 }
 0x2ba   :  { %1617 = vmatprep.subr.bf16.mxu1 %v1864_v14 }
 0x2bd   :  { %1618 = vmatpush3.bf16.msra.mxu1 %v1865_v16 }
 0x2be   :  { %1619 = vmatprep.subr.bf16.mxu1 %v1866_v18 }
 0x2c1   :  { %1620 = vmatpush3.bf16.msra.mxu1 %v1867_v19 }
 0x2c2   :  { %1621 = vmatprep.subr.bf16.mxu1 %v1868_v35 }
 0x2c5   :  { %1622 = vmatpush3.bf16.msra.mxu1 %v1869_v36 }
 0x2c6   :  { %1623 = vmatprep.subr.bf16.mxu1 %v1870_v37 }
 0x2c9   :  { %1624 = vmatpush3.bf16.msra.mxu1 %v1871_v38 }
 0x2ca   :  { %1625 = vmatprep.subr.bf16.mxu1 %v1872_v39 }
 0x2cd   :  { %1626 = vmatpush3.bf16.msra.mxu1 %v1873_v40 }
 0x370   :  { %v975_v21 = vpop.f32.mrf.mxu1 }
 0x371   :  { %v976_v27 = vadd.f32 %v975_v21, %v774_v22 }
 0x372   :  { %v977_v23 = vpop.f32.mrf.mxu1 }
 0x373   :  { %v978_v29 = vadd.f32 %v977_v23, %v778_v24 }
 0x374   :  { %v979_v25 = vpop.f32.mrf.mxu1 }
 0x375   :  { %v980_v26 = vadd.f32 %v979_v25, %v774_v22 }
 0x376   :  { %v981_v28 = vpop.f32.mrf.mxu1 }
 0x377   :  { %v982_v30 = vadd.f32 %v981_v28, %v778_v24  ;;  %v984_v31 = vpack.c.bf16 %v980_v26, %v976_v27 }
 0x379   :  { %v985_v32 = vpack.c.bf16 %v982_v30, %v978_v29  ;;  %v986_v34 = vmax.bf16 %v1949_v0, %v984_v31 }
 0x37b   :  { %v987_v33 = vmax.bf16 %v1949_v0, %v985_v32 }
 0x37d   :  { %1226 = vmatprep.mubr.bf16.mxu0 %v987_v33 }
 0x37e   :  { %1227 = vmatmul.mubr.bf16.vlgmr.msra.gmra.mxu0 %v986_v34 }
 0x43e   :  { %v1228_v42 = vpop.f32.mrf.mxu0 }
 0x43f   :  { %v1229_v48 = vadd.f32 %v1228_v42, %v1027_v43 }
 0x440   :  { %v1230_v44 = vpop.f32.mrf.mxu0 }
 0x441   :  { %v1231_v50 = vadd.f32 %v1230_v44, %v1031_v45 }
 0x442   :  { %v1232_v46 = vpop.f32.mrf.mxu0 }
 0x443   :  { %v1233_v47 = vadd.f32 %v1232_v46, %v1027_v43 }
 0x444   :  { %v1234_v49 = vpop.f32.mrf.mxu0 }
 0x445   :  { %v1235_v51 = vadd.f32 %v1234_v49, %v1031_v45  ;;  %v1237_v52 = vpack.c.bf16 %v1233_v47, %v1229_v48 }
 0x447   :  { %v1238_v53 = vpack.c.bf16 %v1235_v51, %v1231_v50  ;;  %v1239_v55 = vmax.bf16 %v1949_v0, %v1237_v52 }
 0x449   :  { %v1240_v54 = vmax.bf16 %v1949_v0, %v1238_v53 }
 0x44b   :  { %1408 = vmatprep.mubr.bf16.mxu1 %v1240_v54 }
 0x44c   :  { %1409 = vmatmul.mubr.bf16.vlgmr.msra.gmra.mxu1 %v1239_v55 }
 0x50c   :  { %v1627_v56 = vpop.f32.mrf.mxu1 }
 0x50e   :  { %v1628_v17 = vpop.f32.mrf.mxu1 }
 0x50f   :  { %v1629_v57 = vadd.f32 %v1628_v17, %v1627_v56 }
 0x510   :  { %v1630_v58 = vpop.f32.mrf.mxu1 }
 0x511   :  { %v1411_v59 = vadd.f32 %v1629_v57, %v1585_v15 }
 0x512   :  { %v1631_v60 = vpop.f32.mrf.mxu1 }
 0x513   :  { %v1632_v61 = vadd.f32 %v1631_v60, %v1630_v58  ;;  %1874 = vtanh.f32 %v1411_v59 }
 0x515   :  { %v1414_v62 = vadd.f32 %v1632_v61, %v1585_v15 }
 0x517   :  { %1876 = vtanh.f32 %v1414_v62 }
 0x520   :  { %v1875_v63 = vpop.eup %1874 }
 0x521   :  { %v1419_v2 = vadd.f32 1.0, %v1875_v63 }
 0x524   :  { %v1877_v1 = vpop.eup %1876 }
 0x525   :  { %v1420_v0 = vadd.f32 1.0, %v1877_v1 }
 0x527   :  { %v1609_v3 = vpack.c.bf16 %v1420_v0, %v1419_v2 }
 0x529   :  { %1610 = vst [vmem:[%s2055_s7] sm:$0xff] %v1609_v3  }
 0x52a   :  { %1435 = vsyncpa [#allocation3], 1 }
 0x52b   :  { %1436 = vsyncpa [#allocation5], 1 }

</bundles_post_ra>
